<compile_context>
chip_gen: v6e
topology: v6e:2x2x1
jax: 0.10.0
libtpu: 0.0.40
codegen_flags: <defaults>
</compile_context>

<pallas_src>
import functools

import jax
import jax.numpy as jnp
from jax.experimental import pallas as pl
from jax.experimental.pallas import tpu as pltpu


def _round_up(a, b):
    return ((a + b - 1) // b) * b


def _vmem_limit_bytes():
    cap = 64 * 1024 * 1024  # assume smallest per-TC VMEM (v7x) if query fails
    try:
        cap = int(pltpu.get_tpu_info().vmem_capacity_bytes)
    except Exception:
        pass
    # 3/4 of physical, capped at 64 MiB: 48 MiB on v7x, 64 MiB on v5e/v6e.
    return min(64 * 1024 * 1024, (cap * 3) // 4)


# ----------------------------------------------------------------------------
# Fused path: the whole (TB, CHW) row block is resident -> single pallas_call.
# ----------------------------------------------------------------------------
def _layer_norm_fused_kernel(x_ref, g_ref, b_ref, o_ref, *, eps, n):
    x = x_ref[...].astype(jnp.float32)                       # (TB, CHW)
    mean = jnp.sum(x, axis=-1, keepdims=True) * (1.0 / n)    # (TB, 1)
    xc = x - mean
    if n > 1:
        # Two-pass (centered) variance: tile is VMEM resident, so the extra
        # sweep is free and avoids E[x^2]-E[x]^2 cancellation.
        var = jnp.sum(xc * xc, axis=-1, keepdims=True) * (1.0 / (n - 1))
    else:
        var = jnp.full_like(mean, jnp.nan)                   # matches torch .std() of 1 elem
    rinv = 1.0 / (jnp.sqrt(var) + eps)                       # one exact per-row reciprocal
    g = g_ref[...].astype(jnp.float32)                       # (1, CHW)
    b = b_ref[...].astype(jnp.float32)                       # (1, CHW)
    # No materialized (TB, CHW) scale temporary: broadcast column then row.
    o_ref[...] = ((xc * rinv) * g + b).astype(o_ref.dtype)


# ----------------------------------------------------------------------------
# Chunked path (large CHW): pass 1 accumulates stats over CHW chunks,
# pass 2 normalizes elementwise.
# ----------------------------------------------------------------------------
def _stats_kernel(x_ref, mean_ref, rinv_ref, s1_ref, s2_ref,
                  *, eps, n, chunk, total, needs_mask):
    k = pl.program_id(1)

    @pl.when(k == 0)
    def _():
        s1_ref[...] = jnp.zeros_like(s1_ref)
        s2_ref[...] = jnp.zeros_like(s2_ref)

    x = x_ref[...].astype(jnp.float32)                       # (TB, TC)
    if needs_mask:
        # Last chunk may extend past CHW; padded lanes hold garbage on read.
        lane = jax.lax.broadcasted_iota(jnp.int32, x.shape, 1)
        valid = (k * chunk + lane) < total
        x = jnp.where(valid, x, 0.0)

    s1_ref[...] += jnp.sum(x, axis=-1, keepdims=True)
    s2_ref[...] += jnp.sum(x * x, axis=-1, keepdims=True)

    @pl.when(k == pl.num_programs(1) - 1)
    def _():
        mean = s1_ref[...] * (1.0 / n)
        if n > 1:
            # TODO(synk): one-pass variance here; a second (x-mean)^2 HBM pass
            # would cost 50% more bandwidth, so accept the f32 cancellation risk.
            var = jnp.maximum((s2_ref[...] - n * mean * mean) / (n - 1), 0.0)
        else:
            var = jnp.full_like(mean, jnp.nan)
        mean_ref[...] = mean
        rinv_ref[...] = 1.0 / (jnp.sqrt(var) + eps)


def _normalize_kernel(x_ref, mean_ref, rinv_ref, g_ref, b_ref, o_ref):
    x = x_ref[...].astype(jnp.float32)                       # (TB, TC)
    xn = (x - mean_ref[...]) * rinv_ref[...]
    o_ref[...] = (xn * g_ref[...].astype(jnp.float32)
                  + b_ref[...].astype(jnp.float32)).astype(o_ref.dtype)


# ----------------------------------------------------------------------------
# Wrapper
# ----------------------------------------------------------------------------
def layer_normalization(x, gamma, beta, *, eps=1e-5, block_bytes=None):
    """x: (N, C, H, W) NCHW.  gamma, beta: (C,).  Returns (N, C, H, W)."""
    N, C, H, W = x.shape
    HW = H * W
    CHW = C * HW

    itemsize = x.dtype.itemsize
    row_align = {1: 32, 2: 16}.get(itemsize, 8)   # dtype-aware sublane rounding
    if block_bytes is None:
        block_bytes = 2 * 1024 * 1024             # per-buffer; 1-4 MiB ~ HBM roofline

    vmem_limit = _vmem_limit_bytes()

    # Lane-dense layout: each sample is one (CHW,) row.
    x2 = x.reshape(N, CHW)
    # Pre-expand affine params to the NCHW flatten order (channel-major).
    # Keep original dtype (cast per-tile in-kernel) to minimize resident VMEM.
    gamma_row = jnp.repeat(gamma, HW).reshape(1, CHW)
    beta_row = jnp.repeat(beta, HW).reshape(1, CHW)

    bytes_per_row = CHW * itemsize
    tb_min = N if N < row_align else row_align

    if bytes_per_row * tb_min <= block_bytes:
        # ---------------- Fused single-sweep path ----------------
        if N <= row_align:
            tb = N                                # block dim == full dim: allowed
        else:
            rows_fit = max(row_align,
                           (block_bytes // bytes_per_row) // row_align * row_align)
            # Keep >= ~8 grid steps when N allows (pipelining + v7x dual-TC).
            tb_steps = max(row_align, _round_up(pl.cdiv(N, 8), row_align))
            tb = min(rows_fit, tb_steps, _round_up(N, row_align))
        grid = (pl.cdiv(N, tb),)

        kernel = functools.partial(_layer_norm_fused_kernel, eps=eps, n=CHW)
        out2 = pl.pallas_call(
            kernel,
            out_shape=jax.ShapeDtypeStruct((N, CHW), x.dtype),
            grid_spec=pltpu.PrefetchScalarGridSpec(
                num_scalar_prefetch=0,
                grid=grid,
                in_specs=[
                    pl.BlockSpec((tb, CHW), lambda i: (i, 0)),
                    pl.BlockSpec((1, CHW), lambda i: (0, 0)),   # resident
                    pl.BlockSpec((1, CHW), lambda i: (0, 0)),   # resident
                ],
                out_specs=pl.BlockSpec((tb, CHW), lambda i: (i, 0)),
            ),
            compiler_params=pltpu.CompilerParams(
                dimension_semantics=("parallel",),
                vmem_limit_bytes=vmem_limit,
            ),
        )(x2, gamma_row, beta_row)
    else:
        # ---------------- Chunked two-kernel path (large CHW) ----------------
        tb = tb_min
        tc = max(128, (block_bytes // (tb * itemsize)) // 128 * 128)
        tc = min(tc, _round_up(CHW, 128))
        num_chunks = pl.cdiv(CHW, tc)
        grid_rows = pl.cdiv(N, tb)
        needs_mask = (CHW % tc) != 0

        stats_kernel = functools.partial(
            _stats_kernel, eps=eps, n=CHW, chunk=tc, total=CHW, needs_mask=needs_mask)
        mean, rinv = pl.pallas_call(
            stats_kernel,
            out_shape=(jax.ShapeDtypeStruct((N, 1), jnp.float32),
                       jax.ShapeDtypeStruct((N, 1), jnp.float32)),
            grid_spec=pltpu.PrefetchScalarGridSpec(
                num_scalar_prefetch=0,
                grid=(grid_rows, num_chunks),
                in_specs=[pl.BlockSpec((tb, tc), lambda i, k: (i, k))],
                out_specs=[pl.BlockSpec((tb, 1), lambda i, k: (i, 0)),
                           pl.BlockSpec((tb, 1), lambda i, k: (i, 0))],
                scratch_shapes=[pltpu.VMEM((tb, 1), jnp.float32),
                                pltpu.VMEM((tb, 1), jnp.float32)],
            ),
            compiler_params=pltpu.CompilerParams(
                dimension_semantics=("parallel", "arbitrary"),
                vmem_limit_bytes=vmem_limit,
            ),
        )(x2)

        out2 = pl.pallas_call(
            _normalize_kernel,
            out_shape=jax.ShapeDtypeStruct((N, CHW), x.dtype),
            grid_spec=pltpu.PrefetchScalarGridSpec(
                num_scalar_prefetch=0,
                grid=(grid_rows, num_chunks),
                in_specs=[
                    pl.BlockSpec((tb, tc), lambda i, k: (i, k)),
                    pl.BlockSpec((tb, 1), lambda i, k: (i, 0)),
                    pl.BlockSpec((tb, 1), lambda i, k: (i, 0)),
                    pl.BlockSpec((1, tc), lambda i, k: (0, k)),
                    pl.BlockSpec((1, tc), lambda i, k: (0, k)),
                ],
                out_specs=pl.BlockSpec((tb, tc), lambda i, k: (i, k)),
            ),
            compiler_params=pltpu.CompilerParams(
                dimension_semantics=("parallel", "parallel"),
                vmem_limit_bytes=vmem_limit,
            ),
        )(x2, mean, rinv, gamma_row, beta_row)

    return out2.reshape(N, C, H, W)


def _reference(x, gamma, beta, eps=1e-5):
    # Pure-JAX reference mirroring the PyTorch forward (per-sample branch).
    N = x.shape[0]
    xf = x.reshape(N, -1).astype(jnp.float32)
    mean = xf.mean(axis=1)
    var = ((xf - mean[:, None]) ** 2).sum(axis=1) / (xf.shape[1] - 1)
    std = jnp.sqrt(var)
    shape = (N,) + (1,) * (x.ndim - 1)
    y = (x - mean.reshape(shape)) / (std.reshape(shape) + eps)
    gshape = (1, -1) + (1,) * (x.ndim - 2)
    return y * gamma.reshape(gshape) + beta.reshape(gshape)


if __name__ == "__main__":
    key = jax.random.PRNGKey(0)
    kx, kg, kx2, kx3 = jax.random.split(key, 4)

    # Deterministic parameters matching nn.Parameter init:
    # gamma ~ U[0,1) of shape (C,), beta = zeros(C,)
    C = 4
    gamma = jax.random.uniform(kg, (C,), dtype=jnp.float32)
    beta = jnp.zeros((C,), dtype=jnp.float32)

    # Test 1: primary small shape -> fused single-sweep path.
    N, H, W = 2, 16, 16
    x = jax.random.normal(kx, (N, C, H, W), dtype=jnp.float32)
    out = jax.block_until_ready(layer_normalization(x, gamma, beta, eps=1e-5))
    ref = _reference(x, gamma, beta, eps=1e-5)
    assert out.shape == (N, C, H, W)
    assert jnp.allclose(out, ref, atol=1e-5, rtol=1e-5)

    # Test 2: N not a multiple of the row block (cdiv tiling, masked last block).
    x2 = jax.random.normal(kx2, (10, C, 8, 8), dtype=jnp.float32)
    out2 = jax.block_until_ready(layer_normalization(x2, gamma, beta, eps=1e-5))
    ref2 = _reference(x2, gamma, beta, eps=1e-5)
    assert jnp.allclose(out2, ref2, atol=1e-5, rtol=1e-5)

    # Test 3: force the CHW-chunked two-kernel path (large-plane fallback),
    # including a partial (masked) last chunk, at a small shape.
    x3 = jax.random.normal(kx3, (3, C, 12, 12), dtype=jnp.float32)
    out3 = jax.block_until_ready(
        layer_normalization(x3, gamma, beta, eps=1e-5, block_bytes=2048))
    ref3 = _reference(x3, gamma, beta, eps=1e-5)
    assert jnp.allclose(out3, ref3, atol=1e-4, rtol=1e-4)

    print("KERNEL_OK")
</pallas_src>

<mosaic_0001>
module attributes {stable_mosaic.version = 11 : i64} {
  func.func @_layer_norm_fused_kernel(%arg0: i32, %arg1: memref<2x1024xf32, #tpu.memory_space<vmem>>, %arg2: memref<1x1024xf32, #tpu.memory_space<vmem>>, %arg3: memref<1x1024xf32, #tpu.memory_space<vmem>>, %arg4: memref<2x1024xf32, #tpu.memory_space<vmem>>) attributes {dimension_semantics = [#tpu.dimension_semantics<parallel>], iteration_bounds = array<i64: 1>, scalar_prefetch = 0 : i64, scratch_operands = 0 : i64, tpu.core_type = #tpu.core_type<tc>, window_params = [{transform_indices = @transform_0, window_bounds = array<i64: 2, 1024>}, {pipeline_mode = #tpu.pipeline_mode<synchronous>, transform_indices = @transform_1, window_bounds = array<i64: 1, 1024>}, {pipeline_mode = #tpu.pipeline_mode<synchronous>, transform_indices = @transform_2, window_bounds = array<i64: 1, 1024>}, {transform_indices = @transform_3, window_bounds = array<i64: 2, 1024>}]} {
    %c0 = arith.constant 0 : index
    %c0_0 = arith.constant 0 : index
    %0 = vector.load %arg1[%c0, %c0_0] : memref<2x1024xf32, #tpu.memory_space<vmem>>, vector<2x1024xf32>
    %cst = arith.constant dense<0.000000e+00> : vector<2xf32>
    %1 = vector.multi_reduction <add>, %0, %cst [1] : vector<2x1024xf32> to vector<2xf32>
    %2 = vector.shape_cast %1 : vector<2xf32> to vector<2x1xf32>
    %cst_1 = arith.constant 9.765625E-4 : f32
    %3 = vector.broadcast %cst_1 : f32 to vector<2x1xf32>
    %4 = arith.mulf %2, %3 : vector<2x1xf32>
    %5 = vector.broadcast %4 : vector<2x1xf32> to vector<2x1024xf32>
    %6 = arith.subf %0, %5 : vector<2x1024xf32>
    %7 = arith.mulf %6, %6 : vector<2x1024xf32>
    %cst_2 = arith.constant dense<0.000000e+00> : vector<2xf32>
    %8 = vector.multi_reduction <add>, %7, %cst_2 [1] : vector<2x1024xf32> to vector<2xf32>
    %9 = vector.shape_cast %8 : vector<2xf32> to vector<2x1xf32>
    %cst_3 = arith.constant 9.77517105E-4 : f32
    %10 = vector.broadcast %cst_3 : f32 to vector<2x1xf32>
    %11 = arith.mulf %9, %10 : vector<2x1xf32>
    %12 = math.sqrt %11 : vector<2x1xf32>
    %cst_4 = arith.constant 9.99999974E-6 : f32
    %13 = vector.broadcast %cst_4 : f32 to vector<2x1xf32>
    %14 = arith.addf %12, %13 : vector<2x1xf32>
    %cst_5 = arith.constant 1.000000e+00 : f32
    %15 = vector.broadcast %cst_5 : f32 to vector<2x1xf32>
    %16 = arith.divf %15, %14 : vector<2x1xf32>
    %c0_6 = arith.constant 0 : index
    %c0_7 = arith.constant 0 : index
    %17 = vector.load %arg2[%c0_6, %c0_7] : memref<1x1024xf32, #tpu.memory_space<vmem>>, vector<1x1024xf32>
    %c0_8 = arith.constant 0 : index
    %c0_9 = arith.constant 0 : index
    %18 = vector.load %arg3[%c0_8, %c0_9] : memref<1x1024xf32, #tpu.memory_space<vmem>>, vector<1x1024xf32>
    %19 = vector.broadcast %16 : vector<2x1xf32> to vector<2x1024xf32>
    %20 = arith.mulf %6, %19 : vector<2x1024xf32>
    %21 = vector.broadcast %17 : vector<1x1024xf32> to vector<2x1024xf32>
    %22 = arith.mulf %20, %21 : vector<2x1024xf32>
    %23 = vector.broadcast %18 : vector<1x1024xf32> to vector<2x1024xf32>
    %24 = arith.addf %22, %23 : vector<2x1024xf32>
    %c0_10 = arith.constant 0 : index
    %c0_11 = arith.constant 0 : index
    %25 = vector.load %arg4[%c0_10, %c0_11] : memref<2x1024xf32, #tpu.memory_space<vmem>>, vector<2x1024xf32>
    tpu.vector_store %arg4[%c0_10, %c0_11], %24 {strides = array<i32>} : memref<2x1024xf32, #tpu.memory_space<vmem>>, vector<2x1024xf32>,
    return
  }
  func.func @transform_0(%arg0: i32) -> (i32, i32) {
    %c0_i32 = arith.constant 0 : i32
    %c0_i32_0 = arith.constant 0 : i32
    return %arg0, %c0_i32 : i32, i32
  }
  func.func @transform_1(%arg0: i32) -> (i32, i32) {
    %c0_i32 = arith.constant 0 : i32
    %c0_i32_0 = arith.constant 0 : i32
    %c0_i32_1 = arith.constant 0 : i32
    return %c0_i32, %c0_i32_0 : i32, i32
  }
  func.func @transform_2(%arg0: i32) -> (i32, i32) {
    %c0_i32 = arith.constant 0 : i32
    %c0_i32_0 = arith.constant 0 : i32
    %c0_i32_1 = arith.constant 0 : i32
    return %c0_i32, %c0_i32_0 : i32, i32
  }
  func.func @transform_3(%arg0: i32) -> (i32, i32) {
    %c0_i32 = arith.constant 0 : i32
    %c0_i32_0 = arith.constant 0 : i32
    return %arg0, %c0_i32 : i32, i32
  }
}

</mosaic_0001>

<bundles_post_ra>
// kernel: tpu_custom_call.1
= control target key start
LH: loop header
LB: loop body
LE: loop exit
PB: predicated region body
PF: predicated region fallthrough
CT: control target
= control target key end

     0   :  { %8 = vsyncpa [#allocation3], 0  ;;  %s569_s0 = inlined_call_operand.hbm [shape: f32[2,1024], index: 0, kind: input, shape index: {}]   ;;  %s570_s1 = inlined_call_operand.hbm [shape: f32[1,1024], index: 1, kind: input, shape index: {}]   ;;  %s571_s2 = inlined_call_operand.hbm [shape: f32[1,1024], index: 2, kind: input, shape index: {}]   ;;  %s572_s3 = inlined_call_operand.hbm [shape: f32[2,1024], index: 3, kind: output, shape index: {}]  }
   0x1   :  { %9 = vsyncpa [#allocation6], 0 }
   0x2   :  { %10 = vsyncpa [#allocation4], 0  ;;  %s471_s12 = smov [#allocation5]   ;;  %s472_s14 = smov [#allocation2]  }
   0x3   :  { %s27_s13 = sshll.u32 %s471_s12, 4  ;;  %s17_s15 = sshll.u32 %s472_s14, 4  ;;  %s28_s13 = int_to_ptr.vmem [resolvable:$true] %s27_s13  ;;  %s18_s15 = int_to_ptr.vmem [resolvable:$true] %s17_s15 }
   0x4   :  { %s393_s16 = scalar_lea.vmem %s28_s13, 128  ;;  %p398_p1 = scmp.lt.s32.totalorder %s28_s13, %s28_s13 }
   0x5   :  { %p394_p0 = scmp.ne.s32.totalorder %s28_s13, %s393_s16  ;;  %p399_p2 = scmp.lt.s32.totalorder %s393_s16, %s393_s16 }
   0x7   :  { %p400_p3 = por %p399_p2, %p398_p1 }
   0x9   :  { %p401_p4 = pnand %p400_p3, %p394_p0 }
   0xb   :  { %404 = shalt.err (!%p401_p4)
}
   0xc   :  { %30 = dma.hbm_to_vmem [thread:$0]  %s570_s1, 128, %s28_s13, [#allocation6]  }
   0xd   :  { %s413_s19 = scalar_lea.vmem %s18_s15, 256  ;;  %p418_p6 = scmp.lt.s32.totalorder %s18_s15, %s18_s15 }
   0xe   :  { %p414_p5 = scmp.ne.s32.totalorder %s18_s15, %s413_s19  ;;  %p419_p7 = scmp.lt.s32.totalorder %s413_s19, %s413_s19 }
  0x10   :  { %p420_p8 = por %p419_p7, %p418_p6 }
  0x12   :  { %p421_p9 = pnand %p420_p8, %p414_p5 }
  0x14   :  { %424 = shalt.err (!%p421_p9)
}
  0x15   :  { %20 = dma.hbm_to_vmem [thread:$0]  %s569_s0, 256, %s18_s15, [#allocation3]  }
  0x16   :  { %s473_s22 = smov [#allocation7]  }
  0x17   :  { %s37_s23 = sshll.u32 %s473_s22, 4  ;;  %s38_s23 = int_to_ptr.vmem [resolvable:$true] %s37_s23 }
  0x18   :  { %s433_s24 = scalar_lea.vmem %s38_s23, 128  ;;  %p438_p11 = scmp.lt.s32.totalorder %s38_s23, %s38_s23 }
  0x19   :  { %p434_p10 = scmp.ne.s32.totalorder %s38_s23, %s433_s24  ;;  %p439_p12 = scmp.lt.s32.totalorder %s433_s24, %s433_s24 }
  0x1b   :  { %p440_p13 = por %p439_p12, %p438_p11 }
  0x1d   :  { %p441_p0 = pnand %p440_p13, %p434_p10 }
  0x1f   :  { %444 = shalt.err (!%p441_p0)
}
  0x20   :  { %40 = dma.hbm_to_vmem [thread:$0]  %s571_s2, 128, %s38_s23, [#allocation6]  }
  0x21   :  { %465 = dma.done.wait [#allocation3], 256  }
  0x22   :  { %466 = vsyncadd [#allocation3], 4294967040 }
  0x23   :  { %467 = dma.done.wait [#allocation6], 256  }
  0x24   :  { %468 = vsyncadd [#allocation6], 4294967040  ;;  %v58_v0 = vlaneseq  ;;  %v474_v1 = vmov 1983009808   ;;  %v50_v6 = vld [vmem:[#allocation2] sm:$0xff]  ;;  %v51_v7 = vld [vmem:[#allocation2 + $0x8] sm:$0xff] }
  0x25   :  { %v56_v2 = vunpack.c.l.s4 %v474_v1  ;;  %v54_v8 = vcombine.high %v50_v6, %v50_v6  ;;  %vm96_vm0 = vcmask 1041408   ;;  %v71_v12 = vcombine.high %v51_v7, %v51_v7  ;;  %s476_s0 = smov [#allocation8]  }
  0x26   :  { %v506_v3 = vshrl.u32 %v58_v0, 7  ;;  %v475_v33 = vmov 269488144   ;;  %s363_s2 = sshll.u32 %s476_s0, 4  ;;  %s364_s2 = int_to_ptr.vmem [resolvable:$true] %s363_s2 }
  0x27   :  { %v57_v4 = vunpack.c.0.s8 %v56_v2  ;;  %v117_v34 = vunpack.c.l.s4 %v475_v33  ;;  %s445_s26 = scalar_lea.vmem %s364_s2, 256  ;;  %p450_p2 = scmp.lt.s32.totalorder %s364_s2, %s364_s2 }
  0x28   :  { %p446_p1 = scmp.ne.s32.totalorder %s364_s2, %s445_s26  ;;  %p451_p3 = scmp.lt.s32.totalorder %s445_s26, %s445_s26 }
  0x29   :  { %v509_v5 = vsub.s32 %v57_v4, %v506_v3  ;;  %v118_v35 = vunpack.c.0.s8 %v117_v34 }
  0x2a   :  { %p452_p4 = por %p451_p3, %p450_p2 }
  0x2b   :  { %v61_v9 = vrot.slane %v50_v6, %v509_v5  ;;  %v68_v10 = vrot.slane %v54_v8, %v509_v5  ;;  %v78_v13 = vrot.slane %v51_v7, %v509_v5  ;;  %v85_v19 = vrot.slane %v71_v12, %v509_v5 }
  0x2c   :  { %v524_v36 = vsub.s32 %v118_v35, %v506_v3  ;;  %p453_p5 = pnand %p452_p4, %p446_p1 }
  0x2d   :  { %v69_v11 = vcombine.high %v61_v9, %v61_v9  ;;  %v97_v14 = vsel %vm96_vm0, %v61_v9, 0.0  ;;  %v70_v15 = vcombine.high %v68_v10, %v68_v10  ;;  %v100_v17 = vsel %vm96_vm0, %v68_v10, 0.0 }
  0x2e   :  { %v86_v20 = vcombine.high %v78_v13, %v78_v13  ;;  %v104_v23 = vsel %vm96_vm0, %v78_v13, 0.0  ;;  %v87_v25 = vcombine.high %v85_v19, %v85_v19  ;;  %v108_v28 = vsel %vm96_vm0, %v85_v19, 0.0 }
  0x2f   :  { %v98_v16 = vsel %vm96_vm0, %v69_v11, 0.0  ;;  %v102_v21 = vsel %vm96_vm0, %v70_v15, 0.0  ;;  %v216_v13 = vsub.s32 0, %v506_v3 }
  0x30   :  { %v99_v18 = vadd.f32 %v98_v16, %v97_v14  ;;  %v106_v26 = vsel %vm96_vm0, %v86_v20, 0.0  ;;  %v110_v30 = vsel %vm96_vm0, %v87_v25, 0.0  ;;  %v220_v14 = vsub.s32 1, %v506_v3  ;;  %v200_v20 = vld [vmem:[#allocation5] sm:$0xff] }
  0x31   :  { %v224_v16 = vsub.s32 2, %v506_v3  ;;  %v217_v25 = vrot.slane %v200_v20, %v216_v13 }
  0x32   :  { %v101_v22 = vadd.f32 %v100_v17, %v99_v18  ;;  %v228_v17 = vsub.s32 3, %v506_v3  ;;  %v232_v18 = vsub.s32 4, %v506_v3 }
  0x34   :  { %v103_v24 = vadd.f32 %v102_v21, %v101_v22  ;;  %v236_v21 = vsub.s32 5, %v506_v3  ;;  %v240_v22 = vsub.s32 6, %v506_v3 }
  0x36   :  { %v105_v27 = vadd.f32 %v104_v23, %v103_v24  ;;  %v244_v23 = vsub.s32 7, %v506_v3  ;;  %v201_v24 = vld [vmem:[#allocation7] sm:$0xff] }
  0x37   :  { %v288_v33 = vrot.slane %v201_v24, %v216_v13  ;;  %v292_v34 = vrot.slane %v201_v24, %v220_v14  ;;  %v296_v35 = vrot.slane %v201_v24, %v224_v16 }
  0x38   :  { %v107_v29 = vadd.f32 %v106_v26, %v105_v27  ;;  %v221_v26 = vrot.slane %v200_v20, %v220_v14  ;;  %v225_v27 = vrot.slane %v200_v20, %v224_v16 }
  0x3a   :  { %v109_v31 = vadd.f32 %v108_v28, %v107_v29  ;;  %v229_v28 = vrot.slane %v200_v20, %v228_v17  ;;  %v233_v29 = vrot.slane %v200_v20, %v232_v18 }
  0x3c   :  { %v111_v32 = vadd.f32 %v110_v30, %v109_v31  ;;  %v237_v30 = vrot.slane %v200_v20, %v236_v21  ;;  %v241_v31 = vrot.slane %v200_v20, %v240_v22  ;;  %v247_v3 = vcombine.low %v225_v27, %v229_v28 }
  0x3e   :  { %112 = vadd.xlane.f32.xlu0 %v111_v32  ;;  %v245_v32 = vrot.slane %v200_v20, %v244_v23 }
  0xc7   :  { %v113_v37 = vpop.xlane.xlu0 %112 }
  0xc8   :  { %v114_v38 = vmul.f32 0.0009765625, %v113_v37  ;;  %v300_v37 = vrot.slane %v201_v24, %v228_v17 }
  0xca   :  { %v122_v39 = vrot.slane %v114_v38, %v524_v36  ;;  %v304_v38 = vrot.slane %v201_v24, %v232_v18 }
  0xcc   :  { %v527_v40 = vsub.f32 %v50_v6, %v122_v39  ;;  %v529_v41 = vsub.f32 %v51_v7, %v122_v39  ;;  %v308_v39 = vrot.slane %v201_v24, %v236_v21 }
  0xce   :  { %v126_v42 = vmul.f32 %v527_v40, %v527_v40  ;;  %v127_v43 = vmul.f32 %v529_v41, %v529_v41 }
  0xd0   :  { %v130_v44 = vcombine.high %v126_v42, %v126_v42  ;;  %v137_v45 = vrot.slane %v126_v42, %v509_v5  ;;  %v154_v48 = vrot.slane %v127_v43, %v509_v5  ;;  %v147_v52 = vcombine.high %v127_v43, %v127_v43 }
  0xd1   :  { %v312_v42 = vrot.slane %v201_v24, %v240_v22  ;;  %v316_v43 = vrot.slane %v201_v24, %v244_v23 }
  0xd2   :  { %v144_v46 = vrot.slane %v130_v44, %v509_v5  ;;  %v145_v47 = vcombine.high %v137_v45, %v137_v45  ;;  %v172_v49 = vsel %vm96_vm0, %v137_v45, 0.0  ;;  %v161_v56 = vrot.slane %v147_v52, %v509_v5 }
  0xd3   :  { %v162_v57 = vcombine.high %v154_v48, %v154_v48  ;;  %v179_v60 = vsel %vm96_vm0, %v154_v48, 0.0  ;;  %v246_v44 = vcombine.low %v217_v25, %v221_v26  ;;  %v263_v45 = vcombine.low %v233_v29, %v237_v30 }
  0xd4   :  { %v173_v50 = vsel %vm96_vm0, %v145_v47, 0.0  ;;  %v146_v51 = vcombine.high %v144_v46, %v144_v46  ;;  %v175_v54 = vsel %vm96_vm0, %v144_v46, 0.0  ;;  %v163_v62 = vcombine.high %v161_v56, %v161_v56 }
  0xd5   :  { %v174_v53 = vadd.f32 %v173_v50, %v172_v49  ;;  %v181_v63 = vsel %vm96_vm0, %v162_v57, 0.0  ;;  %v183_v1 = vsel %vm96_vm0, %v161_v56, 0.0  ;;  %v264_v46 = vcombine.low %v241_v31, %v245_v32 }
  0xd6   :  { %v177_v58 = vsel %vm96_vm0, %v146_v51, 0.0  ;;  %v185_v4 = vsel %vm96_vm0, %v163_v62, 0.0  ;;  %v317_v47 = vcombine.low %v288_v33, %v292_v34  ;;  %v318_v48 = vcombine.low %v296_v35, %v300_v37 }
  0xd7   :  { %v176_v55 = vadd.f32 %v175_v54, %v174_v53  ;;  %v334_v49 = vcombine.low %v304_v38, %v308_v39  ;;  %v335_v50 = vcombine.low %v312_v42, %v316_v43  ;;  %v254_v51 = vrot.slane %v246_v44, %v509_v5 }
  0xd8   :  { %v261_v52 = vrot.slane %v247_v3, %v509_v5  ;;  %v271_v53 = vrot.slane %v263_v45, %v509_v5  ;;  %v278_v54 = vrot.slane %v264_v46, %v509_v5  ;;  %v332_v56 = vrot.slane %v318_v48, %v509_v5 }
  0xd9   :  { %v178_v59 = vadd.f32 %v177_v58, %v176_v55  ;;  %v325_v55 = vrot.slane %v317_v47, %v509_v5  ;;  %v342_v57 = vrot.slane %v334_v49, %v509_v5  ;;  %v349_v58 = vrot.slane %v335_v50, %v509_v5 }
  0xda   :  { %v279_v62 = vcombine.low %v271_v53, %v278_v54 }
  0xdb   :  { %v180_v61 = vadd.f32 %v179_v60, %v178_v59 }
  0xdd   :  { %v182_v0 = vadd.f32 %v181_v63, %v180_v61  ;;  %v262_v61 = vcombine.low %v254_v51, %v261_v52 }
  0xdf   :  { %v184_v2 = vadd.f32 %v183_v1, %v182_v0  ;;  %v333_v1 = vcombine.low %v325_v55, %v332_v56 }
  0xe1   :  { %v186_v6 = vadd.f32 %v185_v4, %v184_v2  ;;  %v350_v2 = vcombine.low %v342_v57, %v349_v58 }
  0xe3   :  { %187 = vadd.xlane.f32.xlu0 %v186_v6 }
 0x16c   :  { %v188_v7 = vpop.xlane.xlu0 %187 }
 0x16d   :  { %v189_v8 = vmul.f32 0.0009775171, %v188_v7 }
 0x16f   :  { %381 = vrsqrt.f32 %v189_v8  ;;  %vm192_vm1 = vcmp.eq.f32.partialorder %v189_v8, inf  ;;  %v195_v11 = vand.u32 2147483648, %v189_v8  ;;  %vm194_vm2 = vcmp.eq.f32.partialorder %v189_v8, 0.0 }
 0x17c   :  { %v382_v9 = vpop.eup %381 }
 0x17d   :  { %v191_v10 = vmul.f32 %v382_v9, %v189_v8 }
 0x17f   :  { %v193_v12 = vsel %vm192_vm1, %v189_v8, %v191_v10 }
 0x180   :  { %v196_v15 = vsel %vm194_vm2, %v195_v11, %v193_v12 }
 0x181   :  { %v197_v19 = vadd.f32 1e-05, %v196_v15 }
 0x183   :  { %383 = vrcp.f32 %v197_v19 }
 0x190   :  { %v384_v59 = vpop.eup %383 }
 0x191   :  { %v209_v60 = vrot.slane %v384_v59, %v524_v36 }
 0x193   :  { %v211_v63 = vmul.f32 %v209_v60, %v527_v40  ;;  %v212_v0 = vmul.f32 %v209_v60, %v529_v41 }
 0x195   :  { %v282_v4 = vmul.f32 %v262_v61, %v211_v63  ;;  %v283_v6 = vmul.f32 %v279_v62, %v212_v0 }
 0x197   :  { %v353_v7 = vadd.f32 %v333_v1, %v282_v4  ;;  %v354_v8 = vadd.f32 %v350_v2, %v283_v6 }
 0x199   :  { %355 = vst [vmem:[#allocation8] sm:$0xff] %v353_v7  ;;  %356 = vst [vmem:[#allocation8 + $0x8] sm:$0xff] %v354_v8 }
 0x19a   :  { %456 = shalt.err (!%p453_p5)
}
 0x19b   :  { %366 = dma.vmem_to_hbm [thread:$0]  %s364_s2, 256, %s572_s3, [#allocation4]  }
 0x19c   :  { %469 = dma.done.wait [#allocation4], 256  }
 0x19d   :  { %470 = vsyncadd [#allocation4], 4294967040 }
 0x19e   :  { %370 = vsyncpa [#allocation3], 1 }
 0x19f   :  { %371 = vsyncpa [#allocation6], 1 }
 0x1a0   :  { %372 = vsyncpa [#allocation4], 1 }

</bundles_post_ra>
